<compile_context>
chip_gen: v6e
topology: v6e:2x2x1
jax: 0.10.0
libtpu: 0.0.40
codegen_flags: <defaults>
</compile_context>

<pallas_src>
import math

import jax
import jax.numpy as jnp
from jax import lax
from jax.experimental import pallas as pl
from jax.experimental.pallas import tpu as pltpu

# Model hyper-parameters (CNN(channels=9, num_classes=5, input_shape=(9, 1071)))
IN_ROWS = 9        # conv length axis (input_shape[0])
IN_FEAT = 1071     # fc1 input features (input_shape[1])
CHANNELS = 9       # fc1 output channels == conv1 in_channels
NUM_CLASSES = 5
K = 3              # conv kernel size
C1, C2, C3 = 32, 64, 32
FEAT_DIM = C3      # feature dim after global average pool
PACK_W = 128       # packed (features | logits) output lane width
MIN_TB = 16        # batch-tile granularity (keeps tb*9 16-sublane aligned for bf16)

# Static invariants the fused kernel relies on:
#  * fc1's output-channel axis becomes conv1's input-channel axis after the
#    permute, so the module only type-checks when channels == 9 == IN_ROWS.
#  * after three 'valid' k=3 convs the per-element length is 9 - 3*2 = 3 and the
#    valid rows sit at flattened offsets b*9 + {0,1,2}; conv windows of valid
#    rows never leave their own element's 9-row stripe, so rows straddling two
#    batch elements (and ragged-block garbage rows) are computed but never read.
assert CHANNELS == IN_ROWS
assert IN_ROWS - 3 * (K - 1) == 3


def cnn_kernel(x_ref, w1_ref, b1_ref,
               wc1_ref, bc1_ref, wc2_ref, bc2_ref, wc3_ref, bc3_ref,
               wfc_ref, bfc_ref,
               out_ref,
               im1_ref, im2_ref, im3_ref, s_ref):
    """One grid step == tb batch elements, flattened to rows = tb * IN_ROWS."""
    rows = x_ref.shape[0]            # tb * IN_ROWS (static)
    tb = out_ref.shape[0]
    l1 = rows - (K - 1)
    l2 = rows - 2 * (K - 1)
    l3 = rows - 3 * (K - 1)

    # fc1: (rows, 1071) . (9, 1071)^T -> (rows, 9); bf16 operands, f32 accumulate.
    h0 = lax.dot_general(x_ref[...], w1_ref[...],
                         dimension_numbers=(((1,), (1,)), ((), ())),
                         preferred_element_type=jnp.float32) + b1_ref[...]
    # PyTorch's permute(0,2,1) is a no-op in this flattened (row, channel) layout.

    def scatter_im2col(h, cin, l_out, im_ref):
        # Lane-concatenate the K row-shifted copies of h so each conv layer is a
        # single (l_out, K*cin) @ (K*cin, cout) MXU matmul instead of K matmuls.
        hb = h.astype(im_ref.dtype)
        for k in range(K):                         # static unroll over taps
            im_ref[:, k * cin:(k + 1) * cin] = hb[k:k + l_out]

    def conv_relu(im_ref, w_ref, b_ref):
        acc = jnp.dot(im_ref[...], w_ref[...], preferred_element_type=jnp.float32)
        return jnp.maximum(acc + b_ref[...], 0.0)

    scatter_im2col(h0, CHANNELS, l1, im1_ref)
    h1 = conv_relu(im1_ref, wc1_ref, bc1_ref)          # (l1, 32), valid L=7
    scatter_im2col(h1, C1, l2, im2_ref)
    h2 = conv_relu(im2_ref, wc2_ref, bc2_ref)          # (l2, 64), valid L=5
    scatter_im2col(h2, C2, l3, im3_ref)
    h3 = conv_relu(im3_ref, wc3_ref, bc3_ref)          # (l3, 32), valid L=3

    # AdaptiveAvgPool1d(1): mean of rows b*9 + {0,1,2}. Sliding 3-row sum, then
    # one aligned stride-9 gather (replaces the old mostly-zero pool matmul).
    s_ref[pl.ds(0, l3 - 2), :] = h3[0:l3 - 2] + h3[1:l3 - 1] + h3[2:l3]
    pooled = s_ref[pl.ds(0, tb, stride=IN_ROWS), :] * (1.0 / 3.0)     # (tb, 32) f32

    # fc: (tb, 32) . (num_classes, 32)^T -> (tb, num_classes)
    logits = lax.dot_general(pooled.astype(wfc_ref.dtype), wfc_ref[...],
                             dimension_numbers=(((1,), (1,)), ((), ())),
                             preferred_element_type=jnp.float32) + bfc_ref[...]

    # Packed lane-dense output slab: feats in lanes [0, 32), logits in [32, 37).
    out_ref[:, 0:FEAT_DIM] = pooled
    out_ref[:, FEAT_DIM:FEAT_DIM + NUM_CLASSES] = logits


def _round_up(v, m):
    return -(-v // m) * m


def _pick_tb(batch, block_batch):
    """Batch-tile size: full array for tiny batches; otherwise a multiple of 16
    chosen so there are >= 2 grid steps (feeds both v7x TensorCores)."""
    if batch <= 2 * MIN_TB:
        return batch
    cap = max(MIN_TB, (min(block_batch, batch) // MIN_TB) * MIN_TB)
    return min(cap, _round_up(-(-batch // 2), MIN_TB))


def cnn_forward(x, params, *, block_batch=256, mxu_dtype=jnp.bfloat16):
    """Fused CNN forward. x: (B, 9, 1071). Returns (logits, features).

    mxu_dtype=bfloat16 (default) keeps every matmul single-pass on the MXU and
    halves the dominant x HBM stream; accumulation is always f32.
    block_batch=256 fits every generation's scoped VMEM (v6e can go 512+,
    v5e gains little beyond 128-192).
    """
    (w_fc1, b_fc1, w_c1, b_c1, w_c2, b_c2, w_c3, b_c3, w_fc, b_fc) = params
    batch = x.shape[0]
    assert x.shape[1:] == (IN_ROWS, IN_FEAT), x.shape

    cdt = jnp.dtype(mxu_dtype)
    tb = _pick_tb(batch, block_batch)
    grid = -(-batch // tb)
    rows = tb * IN_ROWS
    l1, l2, l3 = rows - 2, rows - 4, rows - 6

    # Flatten to (B*9, 1071): lane-dense, one contiguous DMA per grid step. When
    # batch % tb != 0 the last block reads past the end of x (garbage rows) and
    # its out-of-range output rows are dropped by Pallas; valid rows never
    # consume garbage rows, so no explicit padding copy of x is needed.
    x_flat = x.reshape(batch * IN_ROWS, IN_FEAT).astype(cdt)

    # Parameter re-layout (plain JAX glue, tiny).
    w1 = w_fc1.astype(cdt)                                   # (9, 1071), natural
    b1 = b_fc1.reshape(1, CHANNELS).astype(jnp.float32)

    def cat_taps(w):   # (Cout, Cin, K) -> (K*Cin, Cout), matching im2col lanes
        cout, cin, k = w.shape
        return jnp.transpose(w, (2, 1, 0)).reshape(k * cin, cout).astype(cdt)

    wc1, bc1 = cat_taps(w_c1), b_c1.reshape(1, -1).astype(jnp.float32)
    wc2, bc2 = cat_taps(w_c2), b_c2.reshape(1, -1).astype(jnp.float32)
    wc3, bc3 = cat_taps(w_c3), b_c3.reshape(1, -1).astype(jnp.float32)
    wfc = w_fc.astype(cdt)                                   # (num_classes, 32)
    bfc = b_fc.reshape(1, NUM_CLASSES).astype(jnp.float32)

    def full2d(a):
        return pl.BlockSpec(a.shape, lambda b: (0, 0))

    in_specs = [
        pl.BlockSpec((rows, IN_FEAT), lambda b: (b, 0)),
        full2d(w1), full2d(b1),
        full2d(wc1), full2d(bc1),
        full2d(wc2), full2d(bc2),
        full2d(wc3), full2d(bc3),
        full2d(wfc), full2d(bfc),
    ]
    out_spec = pl.BlockSpec((tb, PACK_W), lambda b: (b, 0))

    # Rough VMEM footprint (double-buffered x/out + scratch), padded to tiles.
    def buf_bytes(shape, dt):
        return (_round_up(shape[0], 16) * _round_up(shape[1], 128)
                * jnp.dtype(dt).itemsize)

    vmem_est = (2 * buf_bytes((rows, IN_FEAT), cdt)
                + 2 * buf_bytes((tb, PACK_W), jnp.float32)
                + buf_bytes((l1, K * CHANNELS), cdt)
                + buf_bytes((l2, K * C1), cdt)
                + buf_bytes((l3, K * C2), cdt)
                + buf_bytes((rows, C3), jnp.float32)
                + (2 << 20))
    vmem_limit = int(min(100 << 20, max(32 << 20, vmem_est)))

    packed = pl.pallas_call(
        cnn_kernel,
        out_shape=jax.ShapeDtypeStruct((batch, PACK_W), jnp.float32),
        grid=(grid,),
        in_specs=in_specs,
        out_specs=out_spec,
        scratch_shapes=[
            pltpu.VMEM((l1, K * CHANNELS), cdt),      # conv1 im2col LHS
            pltpu.VMEM((l2, K * C1), cdt),            # conv2 im2col LHS
            pltpu.VMEM((l3, K * C2), cdt),            # conv3 im2col LHS
            pltpu.VMEM((rows, C3), jnp.float32),      # sliding-sum buffer for pool
        ],
        compiler_params=pltpu.CompilerParams(
            dimension_semantics=("parallel",),
            vmem_limit_bytes=vmem_limit),
    )(x_flat, w1, b1, wc1, bc1, wc2, bc2, wc3, bc3, wfc, bfc)

    feats = packed[:, :FEAT_DIM]
    logits = packed[:, FEAT_DIM:FEAT_DIM + NUM_CLASSES]
    return logits, feats


def cnn_reference(x, params):
    """Pure-JAX reference mirroring the PyTorch forward (for validation)."""
    (w_fc1, b_fc1, w_c1, b_c1, w_c2, b_c2, w_c3, b_c3, w_fc, b_fc) = params
    hp = jax.lax.Precision.HIGHEST
    h = jnp.einsum('brf,cf->brc', x, w_fc1, precision=hp) + b_fc1     # (B, R, C)
    h = jnp.transpose(h, (0, 2, 1))                                   # (B, C, R)

    def conv1d_relu(inp, w, b):
        k = w.shape[2]
        lout = inp.shape[2] - k + 1
        out = jnp.zeros((inp.shape[0], w.shape[0], lout), jnp.float32)
        for kk in range(k):
            out = out + jnp.einsum('bcl,oc->bol', inp[:, :, kk:kk + lout],
                                   w[:, :, kk], precision=hp)
        return jax.nn.relu(out + b[None, :, None])

    h = conv1d_relu(h, w_c1, b_c1)
    h = conv1d_relu(h, w_c2, b_c2)
    h = conv1d_relu(h, w_c3, b_c3)
    feats = jnp.mean(h, axis=-1)                                      # (B, 32)
    logits = jnp.einsum('bc,oc->bo', feats, w_fc, precision=hp) + b_fc
    return logits, feats


def init_params(key):
    """Deterministic PyTorch-style uniform(-1/sqrt(fan_in), 1/sqrt(fan_in)) init."""
    def uniform(k, shape, fan_in):
        bound = 1.0 / math.sqrt(fan_in)
        return jax.random.uniform(k, shape, jnp.float32, -bound, bound)

    keys = jax.random.split(key, 10)
    w_fc1 = uniform(keys[0], (CHANNELS, IN_FEAT), IN_FEAT)
    b_fc1 = uniform(keys[1], (CHANNELS,), IN_FEAT)
    w_c1 = uniform(keys[2], (C1, CHANNELS, K), CHANNELS * K)
    b_c1 = uniform(keys[3], (C1,), CHANNELS * K)
    w_c2 = uniform(keys[4], (C2, C1, K), C1 * K)
    b_c2 = uniform(keys[5], (C2,), C1 * K)
    w_c3 = uniform(keys[6], (C3, C2, K), C2 * K)
    b_c3 = uniform(keys[7], (C3,), C2 * K)
    w_fc = uniform(keys[8], (NUM_CLASSES, FEAT_DIM), FEAT_DIM)
    b_fc = uniform(keys[9], (NUM_CLASSES,), FEAT_DIM)
    return (w_fc1, b_fc1, w_c1, b_c1, w_c2, b_c2, w_c3, b_c3, w_fc, b_fc)


if __name__ == "__main__":
    key = jax.random.PRNGKey(0)
    pkey, xkey, xkey2 = jax.random.split(key, 3)
    params = init_params(pkey)

    fwd = jax.jit(cnn_forward)

    # Reference evaluated on bf16-rounded x / weights (kernel uses bf16 MXU
    # operands with f32 accumulation); intermediate-rounding error is << 1e-2.
    def rnd(a):
        return a.astype(jnp.bfloat16).astype(jnp.float32)

    params_r = (rnd(params[0]), params[1], rnd(params[2]), params[3],
                rnd(params[4]), params[5], rnd(params[6]), params[7],
                rnd(params[8]), params[9])

    # Small batch: single full-array block, grid = 1.
    batch = 2
    x = jax.random.normal(xkey, (batch, IN_ROWS, IN_FEAT), jnp.float32)
    logits, feats = fwd(x, params)
    jax.block_until_ready((logits, feats))
    assert logits.shape == (batch, NUM_CLASSES), logits.shape
    assert feats.shape == (batch, FEAT_DIM), feats.shape
    ref_logits, ref_feats = cnn_reference(rnd(x), params_r)
    assert jnp.allclose(logits, ref_logits, atol=1e-2, rtol=1e-2)
    assert jnp.allclose(feats, ref_feats, atol=1e-2, rtol=1e-2)

    # Larger batch: grid > 1 (both v7x TensorCores fed) + ragged last block.
    batch2 = 40
    x2 = jax.random.normal(xkey2, (batch2, IN_ROWS, IN_FEAT), jnp.float32)
    logits2, feats2 = fwd(x2, params)
    jax.block_until_ready((logits2, feats2))
    ref_logits2, ref_feats2 = cnn_reference(rnd(x2), params_r)
    assert jnp.allclose(logits2, ref_logits2, atol=1e-2, rtol=1e-2)
    assert jnp.allclose(feats2, ref_feats2, atol=1e-2, rtol=1e-2)

    print("KERNEL_OK")
</pallas_src>

<mosaic_0001>
module attributes {stable_mosaic.version = 11 : i64} {
  func.func @cnn_kernel(%arg0: i32, %arg1: memref<18x1071xbf16, #tpu.memory_space<vmem>>, %arg2: memref<9x1071xbf16, #tpu.memory_space<vmem>>, %arg3: memref<1x9xf32, #tpu.memory_space<vmem>>, %arg4: memref<27x32xbf16, #tpu.memory_space<vmem>>, %arg5: memref<1x32xf32, #tpu.memory_space<vmem>>, %arg6: memref<96x64xbf16, #tpu.memory_space<vmem>>, %arg7: memref<1x64xf32, #tpu.memory_space<vmem>>, %arg8: memref<192x32xbf16, #tpu.memory_space<vmem>>, %arg9: memref<1x32xf32, #tpu.memory_space<vmem>>, %arg10: memref<5x32xbf16, #tpu.memory_space<vmem>>, %arg11: memref<1x5xf32, #tpu.memory_space<vmem>>, %arg12: memref<2x128xf32, #tpu.memory_space<vmem>>, %arg13: memref<16x27xbf16, #tpu.memory_space<vmem>>, %arg14: memref<14x96xbf16, #tpu.memory_space<vmem>>, %arg15: memref<12x192xbf16, #tpu.memory_space<vmem>>, %arg16: memref<18x32xf32, #tpu.memory_space<vmem>>) attributes {dimension_semantics = [#tpu.dimension_semantics<parallel>], iteration_bounds = array<i64: 1>, scalar_prefetch = 0 : i64, scratch_operands = 4 : i64, tpu.core_type = #tpu.core_type<tc>, window_params = [{transform_indices = @transform_0, window_bounds = array<i64: 18, 1071>}, {pipeline_mode = #tpu.pipeline_mode<synchronous>, transform_indices = @transform_1, window_bounds = array<i64: 9, 1071>}, {pipeline_mode = #tpu.pipeline_mode<synchronous>, transform_indices = @transform_2, window_bounds = array<i64: 1, 9>}, {pipeline_mode = #tpu.pipeline_mode<synchronous>, transform_indices = @transform_3, window_bounds = array<i64: 27, 32>}, {pipeline_mode = #tpu.pipeline_mode<synchronous>, transform_indices = @transform_4, window_bounds = array<i64: 1, 32>}, {pipeline_mode = #tpu.pipeline_mode<synchronous>, transform_indices = @transform_5, window_bounds = array<i64: 96, 64>}, {pipeline_mode = #tpu.pipeline_mode<synchronous>, transform_indices = @transform_6, window_bounds = array<i64: 1, 64>}, {pipeline_mode = #tpu.pipeline_mode<synchronous>, transform_indices = @transform_7, window_bounds = array<i64: 192, 32>}, {pipeline_mode = #tpu.pipeline_mode<synchronous>, transform_indices = @transform_8, window_bounds = array<i64: 1, 32>}, {pipeline_mode = #tpu.pipeline_mode<synchronous>, transform_indices = @transform_9, window_bounds = array<i64: 5, 32>}, {pipeline_mode = #tpu.pipeline_mode<synchronous>, transform_indices = @transform_10, window_bounds = array<i64: 1, 5>}, {transform_indices = @transform_11, window_bounds = array<i64: 2, 128>}]} {
    %c0 = arith.constant 0 : index
    %c0_0 = arith.constant 0 : index
    %0 = vector.load %arg1[%c0, %c0_0] : memref<18x1071xbf16, #tpu.memory_space<vmem>>, vector<18x1071xbf16>
    %c0_1 = arith.constant 0 : index
    %c0_2 = arith.constant 0 : index
    %1 = vector.load %arg2[%c0_1, %c0_2] : memref<9x1071xbf16, #tpu.memory_space<vmem>>, vector<9x1071xbf16>
    %cst = arith.constant dense<0.000000e+00> : vector<18x9xf32>
    %2 = tpu.matmul %0, %1, %cst {dimension_numbers = #tpu.dot_dimension_numbers<[1], [1], [0], [0], [0, 0, 1, 0], [], []>} : vector<18x1071xbf16>, vector<9x1071xbf16>, vector<18x9xf32> -> vector<18x9xf32>
    %c0_3 = arith.constant 0 : index
    %c0_4 = arith.constant 0 : index
    %3 = vector.load %arg3[%c0_3, %c0_4] : memref<1x9xf32, #tpu.memory_space<vmem>>, vector<1x9xf32>
    %4 = vector.broadcast %3 : vector<1x9xf32> to vector<18x9xf32>
    %5 = arith.addf %2, %4 : vector<18x9xf32>
    %6 = arith.truncf %5 : vector<18x9xf32> to vector<18x9xbf16>
    %7 = vector.extract_strided_slice %6 {offsets = [0, 0], sizes = [16, 9], strides = [1, 1]} : vector<18x9xbf16> to vector<16x9xbf16>
    %c0_5 = arith.constant 0 : index
    %c0_6 = arith.constant 0 : index
    %8 = vector.load %arg13[%c0_5, %c0_6] : memref<16x27xbf16, #tpu.memory_space<vmem>>, vector<16x9xbf16>
    tpu.vector_store %arg13[%c0_5, %c0_6], %7 {strides = array<i32>} : memref<16x27xbf16, #tpu.memory_space<vmem>>, vector<16x9xbf16>,
    %9 = vector.extract_strided_slice %6 {offsets = [1, 0], sizes = [16, 9], strides = [1, 1]} : vector<18x9xbf16> to vector<16x9xbf16>
    %c0_7 = arith.constant 0 : index
    %c9 = arith.constant 9 : index
    %10 = vector.load %arg13[%c0_7, %c9] : memref<16x27xbf16, #tpu.memory_space<vmem>>, vector<16x9xbf16>
    tpu.vector_store %arg13[%c0_7, %c9], %9 {strides = array<i32>} : memref<16x27xbf16, #tpu.memory_space<vmem>>, vector<16x9xbf16>,
    %11 = vector.extract_strided_slice %6 {offsets = [2, 0], sizes = [16, 9], strides = [1, 1]} : vector<18x9xbf16> to vector<16x9xbf16>
    %c0_8 = arith.constant 0 : index
    %c18 = arith.constant 18 : index
    %12 = vector.load %arg13[%c0_8, %c18] : memref<16x27xbf16, #tpu.memory_space<vmem>>, vector<16x9xbf16>
    tpu.vector_store %arg13[%c0_8, %c18], %11 {strides = array<i32>} : memref<16x27xbf16, #tpu.memory_space<vmem>>, vector<16x9xbf16>,
    %c0_9 = arith.constant 0 : index
    %c0_10 = arith.constant 0 : index
    %13 = vector.load %arg13[%c0_9, %c0_10] : memref<16x27xbf16, #tpu.memory_space<vmem>>, vector<16x27xbf16>
    %c0_11 = arith.constant 0 : index
    %c0_12 = arith.constant 0 : index
    %14 = vector.load %arg4[%c0_11, %c0_12] : memref<27x32xbf16, #tpu.memory_space<vmem>>, vector<27x32xbf16>
    %cst_13 = arith.constant dense<0.000000e+00> : vector<16x32xf32>
    %15 = tpu.matmul %13, %14, %cst_13 {dimension_numbers = #tpu.dot_dimension_numbers<[1], [0], [0], [1], [0, 0, 1, 1], [], []>} : vector<16x27xbf16>, vector<27x32xbf16>, vector<16x32xf32> -> vector<16x32xf32>
    %c0_14 = arith.constant 0 : index
    %c0_15 = arith.constant 0 : index
    %16 = vector.load %arg5[%c0_14, %c0_15] : memref<1x32xf32, #tpu.memory_space<vmem>>, vector<1x32xf32>
    %17 = vector.broadcast %16 : vector<1x32xf32> to vector<16x32xf32>
    %18 = arith.addf %15, %17 : vector<16x32xf32>
    %cst_16 = arith.constant 0.000000e+00 : f32
    %19 = vector.broadcast %cst_16 : f32 to vector<16x32xf32>
    %20 = arith.maximumf %18, %19 : vector<16x32xf32>
    %21 = arith.truncf %20 : vector<16x32xf32> to vector<16x32xbf16>
    %22 = vector.extract_strided_slice %21 {offsets = [0, 0], sizes = [14, 32], strides = [1, 1]} : vector<16x32xbf16> to vector<14x32xbf16>
    %c0_17 = arith.constant 0 : index
    %c0_18 = arith.constant 0 : index
    %23 = vector.load %arg14[%c0_17, %c0_18] : memref<14x96xbf16, #tpu.memory_space<vmem>>, vector<14x32xbf16>
    tpu.vector_store %arg14[%c0_17, %c0_18], %22 {strides = array<i32>} : memref<14x96xbf16, #tpu.memory_space<vmem>>, vector<14x32xbf16>,
    %24 = vector.extract_strided_slice %21 {offsets = [1, 0], sizes = [14, 32], strides = [1, 1]} : vector<16x32xbf16> to vector<14x32xbf16>
    %c0_19 = arith.constant 0 : index
    %c32 = arith.constant 32 : index
    %25 = vector.load %arg14[%c0_19, %c32] : memref<14x96xbf16, #tpu.memory_space<vmem>>, vector<14x32xbf16>
    tpu.vector_store %arg14[%c0_19, %c32], %24 {strides = array<i32>} : memref<14x96xbf16, #tpu.memory_space<vmem>>, vector<14x32xbf16>,
    %26 = vector.extract_strided_slice %21 {offsets = [2, 0], sizes = [14, 32], strides = [1, 1]} : vector<16x32xbf16> to vector<14x32xbf16>
    %c0_20 = arith.constant 0 : index
    %c64 = arith.constant 64 : index
    %27 = vector.load %arg14[%c0_20, %c64] : memref<14x96xbf16, #tpu.memory_space<vmem>>, vector<14x32xbf16>
    tpu.vector_store %arg14[%c0_20, %c64], %26 {strides = array<i32>} : memref<14x96xbf16, #tpu.memory_space<vmem>>, vector<14x32xbf16>,
    %c0_21 = arith.constant 0 : index
    %c0_22 = arith.constant 0 : index
    %28 = vector.load %arg14[%c0_21, %c0_22] : memref<14x96xbf16, #tpu.memory_space<vmem>>, vector<14x96xbf16>
    %c0_23 = arith.constant 0 : index
    %c0_24 = arith.constant 0 : index
    %29 = vector.load %arg6[%c0_23, %c0_24] : memref<96x64xbf16, #tpu.memory_space<vmem>>, vector<96x64xbf16>
    %cst_25 = arith.constant dense<0.000000e+00> : vector<14x64xf32>
    %30 = tpu.matmul %28, %29, %cst_25 {dimension_numbers = #tpu.dot_dimension_numbers<[1], [0], [0], [1], [0, 0, 1, 1], [], []>} : vector<14x96xbf16>, vector<96x64xbf16>, vector<14x64xf32> -> vector<14x64xf32>
    %c0_26 = arith.constant 0 : index
    %c0_27 = arith.constant 0 : index
    %31 = vector.load %arg7[%c0_26, %c0_27] : memref<1x64xf32, #tpu.memory_space<vmem>>, vector<1x64xf32>
    %32 = vector.broadcast %31 : vector<1x64xf32> to vector<14x64xf32>
    %33 = arith.addf %30, %32 : vector<14x64xf32>
    %cst_28 = arith.constant 0.000000e+00 : f32
    %34 = vector.broadcast %cst_28 : f32 to vector<14x64xf32>
    %35 = arith.maximumf %33, %34 : vector<14x64xf32>
    %36 = arith.truncf %35 : vector<14x64xf32> to vector<14x64xbf16>
    %37 = vector.extract_strided_slice %36 {offsets = [0, 0], sizes = [12, 64], strides = [1, 1]} : vector<14x64xbf16> to vector<12x64xbf16>
    %c0_29 = arith.constant 0 : index
    %c0_30 = arith.constant 0 : index
    %38 = vector.load %arg15[%c0_29, %c0_30] : memref<12x192xbf16, #tpu.memory_space<vmem>>, vector<12x64xbf16>
    tpu.vector_store %arg15[%c0_29, %c0_30], %37 {strides = array<i32>} : memref<12x192xbf16, #tpu.memory_space<vmem>>, vector<12x64xbf16>,
    %39 = vector.extract_strided_slice %36 {offsets = [1, 0], sizes = [12, 64], strides = [1, 1]} : vector<14x64xbf16> to vector<12x64xbf16>
    %c0_31 = arith.constant 0 : index
    %c64_32 = arith.constant 64 : index
    %40 = vector.load %arg15[%c0_31, %c64_32] : memref<12x192xbf16, #tpu.memory_space<vmem>>, vector<12x64xbf16>
    tpu.vector_store %arg15[%c0_31, %c64_32], %39 {strides = array<i32>} : memref<12x192xbf16, #tpu.memory_space<vmem>>, vector<12x64xbf16>,
    %41 = vector.extract_strided_slice %36 {offsets = [2, 0], sizes = [12, 64], strides = [1, 1]} : vector<14x64xbf16> to vector<12x64xbf16>
    %c0_33 = arith.constant 0 : index
    %c128 = arith.constant 128 : index
    %42 = vector.load %arg15[%c0_33, %c128] : memref<12x192xbf16, #tpu.memory_space<vmem>>, vector<12x64xbf16>
    tpu.vector_store %arg15[%c0_33, %c128], %41 {strides = array<i32>} : memref<12x192xbf16, #tpu.memory_space<vmem>>, vector<12x64xbf16>,
    %c0_34 = arith.constant 0 : index
    %c0_35 = arith.constant 0 : index
    %43 = vector.load %arg15[%c0_34, %c0_35] : memref<12x192xbf16, #tpu.memory_space<vmem>>, vector<12x192xbf16>
    %c0_36 = arith.constant 0 : index
    %c0_37 = arith.constant 0 : index
    %44 = vector.load %arg8[%c0_36, %c0_37] : memref<192x32xbf16, #tpu.memory_space<vmem>>, vector<192x32xbf16>
    %cst_38 = arith.constant dense<0.000000e+00> : vector<12x32xf32>
    %45 = tpu.matmul %43, %44, %cst_38 {dimension_numbers = #tpu.dot_dimension_numbers<[1], [0], [0], [1], [0, 0, 1, 1], [], []>} : vector<12x192xbf16>, vector<192x32xbf16>, vector<12x32xf32> -> vector<12x32xf32>
    %c0_39 = arith.constant 0 : index
    %c0_40 = arith.constant 0 : index
    %46 = vector.load %arg9[%c0_39, %c0_40] : memref<1x32xf32, #tpu.memory_space<vmem>>, vector<1x32xf32>
    %47 = vector.broadcast %46 : vector<1x32xf32> to vector<12x32xf32>
    %48 = arith.addf %45, %47 : vector<12x32xf32>
    %cst_41 = arith.constant 0.000000e+00 : f32
    %49 = vector.broadcast %cst_41 : f32 to vector<12x32xf32>
    %50 = arith.maximumf %48, %49 : vector<12x32xf32>
    %51 = vector.extract_strided_slice %50 {offsets = [0, 0], sizes = [10, 32], strides = [1, 1]} : vector<12x32xf32> to vector<10x32xf32>
    %52 = vector.extract_strided_slice %50 {offsets = [1, 0], sizes = [10, 32], strides = [1, 1]} : vector<12x32xf32> to vector<10x32xf32>
    %53 = arith.addf %51, %52 : vector<10x32xf32>
    %54 = vector.extract_strided_slice %50 {offsets = [2, 0], sizes = [10, 32], strides = [1, 1]} : vector<12x32xf32> to vector<10x32xf32>
    %55 = arith.addf %53, %54 : vector<10x32xf32>
    %c0_42 = arith.constant 0 : index
    %c0_43 = arith.constant 0 : index
    %56 = vector.load %arg16[%c0_42, %c0_43] : memref<18x32xf32, #tpu.memory_space<vmem>>, vector<10x32xf32>
    tpu.vector_store %arg16[%c0_42, %c0_43], %55 {strides = array<i32>} : memref<18x32xf32, #tpu.memory_space<vmem>>, vector<10x32xf32>,
    %c0_44 = arith.constant 0 : index
    %c0_45 = arith.constant 0 : index
    %57 = tpu.strided_load %arg16[%c0_44, %c0_45] {strides = array<i32: 9, 1>} : memref<18x32xf32, #tpu.memory_space<vmem>>, vector<2x32xf32>
    %cst_46 = arith.constant 0.333333343 : f32
    %58 = vector.broadcast %cst_46 : f32 to vector<2x32xf32>
    %59 = arith.mulf %57, %58 : vector<2x32xf32>
    %60 = arith.truncf %59 : vector<2x32xf32> to vector<2x32xbf16>
    %c0_47 = arith.constant 0 : index
    %c0_48 = arith.constant 0 : index
    %61 = vector.load %arg10[%c0_47, %c0_48] : memref<5x32xbf16, #tpu.memory_space<vmem>>, vector<5x32xbf16>
    %cst_49 = arith.constant dense<0.000000e+00> : vector<2x5xf32>
    %62 = tpu.matmul %60, %61, %cst_49 {dimension_numbers = #tpu.dot_dimension_numbers<[1], [1], [0], [0], [0, 0, 1, 0], [], []>} : vector<2x32xbf16>, vector<5x32xbf16>, vector<2x5xf32> -> vector<2x5xf32>
    %c0_50 = arith.constant 0 : index
    %c0_51 = arith.constant 0 : index
    %63 = vector.load %arg11[%c0_50, %c0_51] : memref<1x5xf32, #tpu.memory_space<vmem>>, vector<1x5xf32>
    %64 = vector.broadcast %63 : vector<1x5xf32> to vector<2x5xf32>
    %65 = arith.addf %62, %64 : vector<2x5xf32>
    %c0_52 = arith.constant 0 : index
    %c0_53 = arith.constant 0 : index
    %66 = vector.load %arg12[%c0_52, %c0_53] : memref<2x128xf32, #tpu.memory_space<vmem>>, vector<2x32xf32>
    tpu.vector_store %arg12[%c0_52, %c0_53], %59 {strides = array<i32>} : memref<2x128xf32, #tpu.memory_space<vmem>>, vector<2x32xf32>,
    %c0_54 = arith.constant 0 : index
    %c32_55 = arith.constant 32 : index
    %67 = vector.load %arg12[%c0_54, %c32_55] : memref<2x128xf32, #tpu.memory_space<vmem>>, vector<2x5xf32>
    tpu.vector_store %arg12[%c0_54, %c32_55], %65 {strides = array<i32>} : memref<2x128xf32, #tpu.memory_space<vmem>>, vector<2x5xf32>,
    return
  }
  func.func @transform_0(%arg0: i32) -> (i32, i32) {
    %c0_i32 = arith.constant 0 : i32
    %c0_i32_0 = arith.constant 0 : i32
    return %arg0, %c0_i32 : i32, i32
  }
  func.func @transform_1(%arg0: i32) -> (i32, i32) {
    %c0_i32 = arith.constant 0 : i32
    %c0_i32_0 = arith.constant 0 : i32
    %c0_i32_1 = arith.constant 0 : i32
    return %c0_i32, %c0_i32_0 : i32, i32
  }
  func.func @transform_2(%arg0: i32) -> (i32, i32) {
    %c0_i32 = arith.constant 0 : i32
    %c0_i32_0 = arith.constant 0 : i32
    %c0_i32_1 = arith.constant 0 : i32
    return %c0_i32, %c0_i32_0 : i32, i32
  }
  func.func @transform_3(%arg0: i32) -> (i32, i32) {
    %c0_i32 = arith.constant 0 : i32
    %c0_i32_0 = arith.constant 0 : i32
    %c0_i32_1 = arith.constant 0 : i32
    return %c0_i32, %c0_i32_0 : i32, i32
  }
  func.func @transform_4(%arg0: i32) -> (i32, i32) {
    %c0_i32 = arith.constant 0 : i32
    %c0_i32_0 = arith.constant 0 : i32
    %c0_i32_1 = arith.constant 0 : i32
    return %c0_i32, %c0_i32_0 : i32, i32
  }
  func.func @transform_5(%arg0: i32) -> (i32, i32) {
    %c0_i32 = arith.constant 0 : i32
    %c0_i32_0 = arith.constant 0 : i32
    %c0_i32_1 = arith.constant 0 : i32
    return %c0_i32, %c0_i32_0 : i32, i32
  }
  func.func @transform_6(%arg0: i32) -> (i32, i32) {
    %c0_i32 = arith.constant 0 : i32
    %c0_i32_0 = arith.constant 0 : i32
    %c0_i32_1 = arith.constant 0 : i32
    return %c0_i32, %c0_i32_0 : i32, i32
  }
  func.func @transform_7(%arg0: i32) -> (i32, i32) {
    %c0_i32 = arith.constant 0 : i32
    %c0_i32_0 = arith.constant 0 : i32
    %c0_i32_1 = arith.constant 0 : i32
    return %c0_i32, %c0_i32_0 : i32, i32
  }
  func.func @transform_8(%arg0: i32) -> (i32, i32) {
    %c0_i32 = arith.constant 0 : i32
    %c0_i32_0 = arith.constant 0 : i32
    %c0_i32_1 = arith.constant 0 : i32
    return %c0_i32, %c0_i32_0 : i32, i32
  }
  func.func @transform_9(%arg0: i32) -> (i32, i32) {
    %c0_i32 = arith.constant 0 : i32
    %c0_i32_0 = arith.constant 0 : i32
    %c0_i32_1 = arith.constant 0 : i32
    return %c0_i32, %c0_i32_0 : i32, i32
  }
  func.func @transform_10(%arg0: i32) -> (i32, i32) {
    %c0_i32 = arith.constant 0 : i32
    %c0_i32_0 = arith.constant 0 : i32
    %c0_i32_1 = arith.constant 0 : i32
    return %c0_i32, %c0_i32_0 : i32, i32
  }
  func.func @transform_11(%arg0: i32) -> (i32, i32) {
    %c0_i32 = arith.constant 0 : i32
    %c0_i32_0 = arith.constant 0 : i32
    return %arg0, %c0_i32 : i32, i32
  }
}

</mosaic_0001>

<bundles_post_ra>
// kernel: cnn_forward.1
= control target key start
LH: loop header
LB: loop body
LE: loop exit
PB: predicated region body
PF: predicated region fallthrough
CT: control target
= control target key end

     0   :  { %vm192_vm0 = vcmask 384000   ;;  %vm451_vm1 = vcmask 68608   ;;  %vm457_vm2 = vsmask.f32 3328  ;;  %vm493_vm3 = vcmask 1042432   ;;  %s1264_s28 = smov 18   ;;  %s1544_s1 = inlined_call_operand.vmem [shape: bf16[9,1071], index: 1, kind: input, shape index: {}]   ;;  %s1545_s0 = inlined_call_operand.vmem [shape: bf16[18,1071], index: 0, kind: input, shape index: {}]   ;;  %s1546_s2 = inlined_call_operand.vmem [shape: f32[1,9], index: 2, kind: input, shape index: {}]   ;;  %s1547_s3 = inlined_call_operand.vmem [shape: bf16[27,32], index: 3, kind: input, shape index: {}]   ;;  %s1548_s5 = inlined_call_operand.vmem [shape: bf16[96,64], index: 5, kind: input, shape index: {}]   ;;  %s1549_s4 = inlined_call_operand.vmem [shape: f32[1,32], index: 4, kind: input, shape index: {}]   ;;  %s1550_s7 = inlined_call_operand.vmem [shape: bf16[192,32], index: 7, kind: input, shape index: {}]   ;;  %s1551_s6 = inlined_call_operand.vmem [shape: f32[1,64], index: 6, kind: input, shape index: {}]   ;;  %s1552_s9 = inlined_call_operand.vmem [shape: bf16[5,32], index: 9, kind: input, shape index: {}]   ;;  %s1553_s8 = inlined_call_operand.vmem [shape: f32[1,32], index: 8, kind: input, shape index: {}]   ;;  %s1554_s11 = inlined_call_operand.vmem [shape: f32[2,128], index: 11, kind: output, shape index: {}]   ;;  %s1555_s10 = inlined_call_operand.vmem [shape: f32[1,5], index: 10, kind: input, shape index: {}]  }
   0x1   :  { %v1201_v0 = vld [vmem:[%s1544_s1 + $0x4] ss:$36 sps:$4 sm:$0x1f]   ;;  %v1209_v4 = vld [vmem:[%s1544_s1 + $0xc] ss:$36 sps:$4 sm:$0x1f]  }
   0x2   :  { %v1203_v1 = vld [vmem:[%s1544_s1] ss:$36 sps:$4 sm:$0x1f]   ;;  %216 = vmatprep.subr.bf16.mxu0 %v1201_v0  ;;  %v1207_v3 = vld [vmem:[%s1544_s1 + $0x8] ss:$36 sps:$4 sm:$0x1f]   ;;  %1190 = vmatprep.subr.bf16.mxu1 %v1209_v4 }
   0x3   :  { %v1206_v2 = vld [vmem:[%s1545_s0 + $0x4] ss:$36 sps:$4 sm:$0xff]   ;;  %217 = vmatpush1.bf16.xpose.msra.mxu0 %v1203_v1  ;;  %v50_v6 = vld [vmem:[%s1545_s0 + $0x50] sm:$0x11]  ;;  %1191 = vmatpush1.bf16.xpose.msra.mxu1 %v1207_v3  ;;  %v1229_v14 = vld [vmem:[%s1545_s0 + $0x1c] ss:$36 sps:$4 sm:$0xff]  }
   0x4   :  { %234 = vmatprep.mubr.bf16.mxu0 %v1206_v2  ;;  %v49_v5 = vld [vmem:[%s1545_s0 + $0x48] sm:$0x11]  ;;  %v1204_v7 = vld [vmem:[%s1545_s0] ss:$36 sps:$4 sm:$0xff]   ;;  %264 = vmatprep.subr.bf16.mxu0 %v1209_v4  ;;  %v1073_v8 = vcombine.high %v50_v6, %v50_v6  ;;  %v1072_v12 = vcombine.low %v50_v6, %v50_v6  ;;  %v1227_v18 = vld [vmem:[%s1545_s0 + $0x18] ss:$36 sps:$4 sm:$0xff]  }
   0x5   :  { %v1071_v9 = vcombine.high %v49_v5, %v49_v5  ;;  %v1219_v10 = vld [vmem:[%s1544_s1 + $0x14] ss:$36 sps:$4 sm:$0x1f]   ;;  %v1222_v11 = vld [vmem:[%s1544_s1 + $0x1c] ss:$36 sps:$4 sm:$0x1f]   ;;  %v1070_v15 = vcombine.low %v49_v5, %v49_v5 }
   0x6   :  { %290 = vmatprep.mubr.bf16.mxu1 %v1073_v8  ;;  %360 = vmatprep.subr.bf16.mxu1 %v1222_v11  ;;  %v1220_v13 = vld [vmem:[%s1544_s1 + $0x18] ss:$36 sps:$4 sm:$0x1f]   ;;  %v1216_v16 = vld [vmem:[%s1545_s0 + $0xc] ss:$36 sps:$4 sm:$0xff]   ;;  %vm545_vm4 = vcmask 1044480  }
   0x7   :  { %v52_v17 = vld [vmem:[%s1545_s0 + $0x60] sm:$0x11]  ;;  %v1214_v20 = vld [vmem:[%s1545_s0 + $0x8] ss:$36 sps:$4 sm:$0xff]   ;;  %v1225_v22 = vld [vmem:[%s1545_s0 + $0x14] ss:$36 sps:$4 sm:$0xff]  }
   0x8   :  { %v1077_v19 = vcombine.high %v52_v17, %v52_v17  ;;  %v1217_v21 = vld [vmem:[%s1544_s1 + $0x10] ss:$36 sps:$4 sm:$0x1f]   ;;  %v1226_v23 = vld [vmem:[%s1544_s1 + $0x20] ss:$36 sps:$4 sm:$0x1f]   ;;  %v1076_v24 = vcombine.low %v52_v17, %v52_v17 }
   0x9   :  { %v51_v25 = vld [vmem:[%s1545_s0 + $0x58] sm:$0x11]  ;;  %v1223_v26 = vld [vmem:[%s1545_s0 + $0x10] ss:$36 sps:$4 sm:$0xff]   ;;  %v200_v28 = vsel %vm192_vm0, %v1226_v23, 0  ;;  %vm494_vm5 = vcmask 1046532  }
   0xa   :  { %235 = vmatmul.mubr.bf16.vlgmr.msra.gmra.mxu0 %v1204_v7  ;;  %291 = vmatmul.mubr.bf16.vlgmr.msra.gmra.mxu1 %v1072_v12  ;;  %v1075_v27 = vcombine.high %v51_v25, %v51_v25  ;;  %v1074_v29 = vcombine.low %v51_v25, %v51_v25  ;;  %v1234_v30 = vld [vmem:[%s1545_s0 + $0x20] ss:$36 sps:$4 sm:$0xff]   ;;  %v1235_v31 = vld [vmem:[%s1545_s0 + $0x68] ss:$0 sps:$4 sm:$0x11]   ;;  %v1261_v12 = vmov 0.0   ;;  %vm1411_vm7 = vmor %vm493_vm3, %vm494_vm5 }
   0xb   :  { %265 = vmatpush1.bf16.xpose.msra.mxu0 %v1207_v3  ;;  %242 = vmatprep.mubr.bf16.mxu0 %v1071_v9  ;;  %v1060_v59 = vld [vmem:[%s1546_s2] ss:$0 sm:$0xff]  ;;  %vm546_vm6 = vcmask 1045504   ;;  %vm458_vm8 = vsmask.f32 7440  ;;  %vm1263_vm9 = vmmov 0  }
   0xc   :  { %312 = vmatprep.subr.bf16.mxu0 %v1219_v10  ;;  %361 = vmatpush1.bf16.xpose.msra.mxu1 %v1220_v13  ;;  %vm1424_vm10 = vmor %vm457_vm2, %vm458_vm8  ;;  %s1265_s29 = smov 9   ;;  %vm490_vm11 = vcmask 142408   ;;  %vm509_vm12 = vcmask 216208   ;;  %vm541_vm13 = vcmask 220160   ;;  %vm603_vm14 = vcmask 257024   ;;  %s1266_s22 = smov 32  }
   0xd   :  { %378 = vmatprep.mubr.bf16.mxu1 %v1229_v14  ;;  %1160 = vmatprep.subr.bf16.mxu1 %v1261_v12  ;;  %vm605_vm15 = vcmask 256000   ;;  %vm647_vm2 = vcmask 781824   ;;  %vm649_vm3 = vcmask 780800   ;;  %vm768_vm5 = vcmask 519168  }
   0xe   :  { %vm770_vm8 = vcmask 517120  }
  0x12   :  { %243 = vmatmul.mubr.bf16.gmra.mxu0 %v1070_v15 }
  0x13   :  { %282 = vmatprep.mubr.bf16.mxu0 %v1216_v16  ;;  %379 = vmatmul.mubr.bf16.vlgmr.msra.gmra.mxu1 %v1227_v18 }
  0x14   :  { %386 = vmatprep.mubr.bf16.mxu1 %v1077_v19 }
  0x1a   :  { %283 = vmatmul.mubr.bf16.vlgmr.msra.gmra.mxu0 %v1214_v20 }
  0x1b   :  { %313 = vmatpush1.bf16.xpose.msra.mxu0 %v1217_v21  ;;  %330 = vmatprep.mubr.bf16.mxu0 %v1225_v22 }
  0x1c   :  { %1192 = vmatprep.subr.msk.bf16.mxu0 %vm192_vm0, %v1226_v23  ;;  %387 = vmatmul.mubr.bf16.gmra.mxu1 %v1076_v24  ;;  %v1236_v23 = vld [vmem:[%s1547_s3 + $0x8] sm:$0x3f]  }
  0x1d   :  { %1164 = vmatprep.mubr.msk.bf16.mxu1 %vm1263_vm9, %v1261_v12 }
  0x22   :  { %331 = vmatmul.mubr.bf16.vlgmr.msra.gmra.mxu0 %v1223_v26 }
  0x23   :  { %1155 = vmatpush3.bf16.xpose.msra.mxu0 %v200_v28  ;;  %338 = vmatprep.mubr.bf16.mxu0 %v1075_v27  ;;  %v1262_v28 = vmov 65535  }
  0x24   :  { %1168 = vmatprep.subr.bf16.mxu0 %v1261_v12 }
  0x2a   :  { %339 = vmatmul.mubr.bf16.gmra.mxu0 %v1074_v29  ;;  %v547_v29 = vsel %vm545_vm4, 4294967295, %v1262_v28  ;;  %vm713_vm4 = vcmask 785408  }
  0x2b   :  { %1156 = vmatprep.mubr.msk.bf16.mxu0 %vm192_vm0, %v1234_v30 }
  0x32   :  { %1157 = vmatmul.mubr.msk.bf16.vlgmr.msra.gmra.mxu0 %vm192_vm0, %v1235_v31  ;;  %vm632_vm0 = vcmask 519424  }
  0x33   :  { %1180 = vmatprep.mubr.msk.bf16.mxu0 %vm1263_vm9, %v1261_v12 }
  0xca   :  { %v236_v32 = vpop.f32.mrf.mxu0  ;;  %v292_v35 = vpop.f32.mrf.mxu1 }
  0xcb   :  { %v237_v63 = vadd.f32 %v1060_v59, %v236_v32 }
  0xcc   :  { %v238_v33 = vpop.f32.mrf.mxu0  ;;  %v294_v37 = vpop.f32.mrf.mxu1 }
  0xcd   :  { %v548_v33 = vsel %vm546_vm6, %v547_v29, 0 }
  0xce   :  { %v239_v34 = vpop.f32.mrf.mxu0  ;;  %v295_v39 = vpop.f32.mrf.mxu1  ;;  %v550_v37 = vand.u32 %v1236_v23, %v548_v33 }
  0xcf   :  { %v240_v4 = vadd.f32 %v1060_v59, %v239_v34 }
  0xd0   :  { %v241_v36 = vpop.f32.mrf.mxu0  ;;  %v296_v41 = vpop.f32.mrf.mxu1  ;;  %1161 = vmatpush3.bf16.msra.mxu1 %v550_v37  ;;  %v1246_v37 = vld [vmem:[%s1550_s7 + $0x38] sm:$0xff]  }
  0xd1   :  { %1162 = vmatprep.subr.bf16.mxu1 %v1261_v12  ;;  %v995_v41 = vld [vmem:[%s1552_s9] sm:$0x7] }
  0xd2   :  { %v244_v38 = vpop.f32.mrf.mxu0 }
  0xd3   :  { %v380_v43 = vpop.f32.mrf.mxu1  ;;  %v245_v61 = vadd.f32 %v1060_v59, %v244_v38  ;;  %v1239_v59 = vld [vmem:[%s1548_s5 + $0x28] sm:$0xff]  }
  0xd4   :  { %v246_v40 = vpop.f32.mrf.mxu0  ;;  %1169 = vmatpush3.bf16.msra.mxu0 %v1239_v59 }
  0xd5   :  { %v382_v45 = vpop.f32.mrf.mxu1  ;;  %v293_v2 = vadd.f32 %v292_v35, %v245_v61  ;;  %1170 = vmatprep.subr.bf16.mxu0 %v1261_v12  ;;  %v1094_v61 = vld [vmem:[%s1549_s4] ss:$0 sm:$0xff] }
  0xd6   :  { %v247_v42 = vpop.f32.mrf.mxu0  ;;  %v1237_v45 = vld [vmem:[%s1547_s3] sm:$0xff]  }
  0xd7   :  { %v383_v47 = vpop.f32.mrf.mxu1  ;;  %1163 = vmatpush3.bf16.msra.mxu1 %v1237_v45  ;;  %v1254_v45 = vld [vmem:[%s1550_s7 + $0x58] sm:$0xff]  }
  0xd8   :  { %v248_v44 = vpop.f32.mrf.mxu0 }
  0xd9   :  { %v385_v49 = vpop.f32.mrf.mxu1 }
  0xda   :  { %v284_v46 = vpop.f32.mrf.mxu0 }
  0xdb   :  { %v285_v1 = vadd.f32 %v284_v46, %v237_v63 }
  0xdc   :  { %v286_v48 = vpop.f32.mrf.mxu0  ;;  %v388_v51 = vpop.f32.mrf.mxu1 }
  0xde   :  { %v287_v50 = vpop.f32.mrf.mxu0  ;;  %v390_v53 = vpop.f32.mrf.mxu1 }
  0xdf   :  { %v288_v8 = vadd.f32 %v287_v50, %v240_v4 }
  0xe0   :  { %v289_v52 = vpop.f32.mrf.mxu0  ;;  %v391_v55 = vpop.f32.mrf.mxu1 }
  0xe2   :  { %v332_v54 = vpop.f32.mrf.mxu0  ;;  %v392_v57 = vpop.f32.mrf.mxu1 }
  0xe3   :  { %v333_v5 = vadd.f32 %v332_v54, %v285_v1 }
  0xe4   :  { %v334_v56 = vpop.f32.mrf.mxu0 }
  0xe5   :  { %v381_v10 = vadd.f32 %v380_v43, %v333_v5 }
  0xe6   :  { %v335_v58 = vpop.f32.mrf.mxu0 }
  0xe7   :  { %v336_v11 = vadd.f32 %v335_v58, %v288_v8 }
  0xe8   :  { %v337_v60 = vpop.f32.mrf.mxu0 }
  0xe9   :  { %v384_v18 = vadd.f32 %v383_v47, %v336_v11  ;;  %v1240_v60 = vld [vmem:[%s1548_s5 + $0x20] sm:$0xff]  }
  0xea   :  { %v340_v62 = vpop.f32.mrf.mxu0  ;;  %1171 = vmatpush3.bf16.msra.mxu0 %v1240_v60 }
  0xeb   :  { %v341_v6 = vadd.f32 %v340_v62, %v293_v2  ;;  %1172 = vmatprep.subr.bf16.mxu0 %v1261_v12  ;;  %v1241_v2 = vld [vmem:[%s1548_s5 + $0x18] sm:$0xff]  }
  0xec   :  { %v342_v0 = vpop.f32.mrf.mxu0 }
  0xed   :  { %v389_v13 = vadd.f32 %v388_v51, %v341_v6 }
  0xee   :  { %v343_v3 = vpop.f32.mrf.mxu0  ;;  %1173 = vmatpush3.bf16.msra.mxu0 %v1241_v2 }
  0xef   :  { %1174 = vmatprep.subr.bf16.mxu0 %v1261_v12 }
  0xf0   :  { %v344_v7 = vpop.f32.mrf.mxu0 }
  0xf2   :  { %v1158_v9 = vpop.f32.mrf.mxu0 }
  0xf3   :  { %v437_v16 = vadd.f32 %v1158_v9, %v389_v13 }
  0xf4   :  { %v428_v14 = vpop.f32.mrf.mxu0 }
  0xf5   :  { %v429_v15 = vadd.f32 %v428_v14, %v381_v10  ;;  %v1134_v24 = vpack.c.bf16 %v437_v16, %v437_v16  ;;  %v1242_v10 = vld [vmem:[%s1548_s5 + $0x10] sm:$0xff]  }
  0xf6   :  { %v1159_v17 = vpop.f32.mrf.mxu0  ;;  %1175 = vmatpush3.bf16.msra.mxu0 %v1242_v10 }
  0xf7   :  { %v1132_v19 = vpack.c.bf16 %v429_v15, %v429_v15  ;;  %v480_v38 = vshll.u32 %v1134_v24, 16  ;;  %v501_v47 = vrot.slane %v1134_v24, 5  ;;  %1176 = vmatprep.subr.bf16.mxu0 %v1261_v12  ;;  %v1243_v15 = vld [vmem:[%s1548_s5 + $0x8] sm:$0xff]  }
  0xf8   :  { %v431_v20 = vpop.f32.mrf.mxu0 }
  0xf9   :  { %v432_v21 = vadd.f32 %v431_v20, %v384_v18  ;;  %v461_v22 = vshrl.u32 %v1132_v19, 16  ;;  %452 = vst.msk [vmem:[#allocation2] sm:$0xf] %vm451_vm1, %v1132_v19  ;;  %v464_v25 = vshll.u32 %v1132_v19, 16  ;;  %v1093_v31 = vrot.slane %v1132_v19, 9 }
  0xfa   :  { %v482_v50 = vrot.slane %v480_v38, 5  ;;  %1177 = vmatpush3.bf16.msra.mxu0 %v1243_v15  ;;  %v1247_v38 = vld [vmem:[%s1550_s7 + $0x30] sm:$0xff]  }
  0xfb   :  { %v1133_v26 = vpack.c.bf16 %v432_v21, %v432_v21  ;;  %v463_v27 = vrot.slane %v461_v22, 4  ;;  %v466_v32 = vrot.slane %v464_v25, 5  ;;  %v1244_v22 = vld [vmem:[%s1548_s5] sm:$0xff]   ;;  %1178 = vmatprep.subr.bf16.mxu0 %v1261_v12  ;;  %s1267_s5 = smov 64  }
  0xfd   :  { %v474_v34 = vshrl.u32 %v1133_v26, 16  ;;  %v498_v35 = vrot.slane %v1133_v26, 5  ;;  %v470_v36 = vshll.u32 %v1133_v26, 16  ;;  %453 = vst.msk [vmem:[#allocation2 + $0x4] sm:$0xf] %vm451_vm1, %v1133_v26  ;;  %v467_v39 = vor.u32 %v466_v32, %v463_v27 }
  0xfe   :  { %1179 = vmatpush3.bf16.msra.mxu0 %v1244_v22  ;;  %vm634_vm1 = vcmask 518400  }
  0xff   :  { %v499_v40 = vsel %vm1411_vm7, %v1093_v31, %v498_v35  ;;  %v472_v42 = vrot.slane %v470_v36, 5  ;;  %v500_v43 = vrot.slane %v498_v35, 4  ;;  %v476_v44 = vrot.slane %v474_v34, 4  ;;  %1184 = vmatprep.subr.bf16.mxu0 %v1261_v12 }
 0x100   :  { %503 = vrot.lane.b32.xlu1 %v499_v40, %s1264_s28  ;;  %v468_v46 = vrot.slane %v467_v39, 4  ;;  %v1268_v36 = vmov 0   ;;  %v1248_v39 = vld [vmem:[%s1550_s7 + $0x28] sm:$0xff]   ;;  %v1250_v40 = vld [vmem:[%s1550_s7 + $0x18] sm:$0xff]  }
 0x101   :  { %v477_v48 = vor.u32 %v476_v44, %v472_v42  ;;  %v502_v51 = vsel %vm1411_vm7, %v500_v43, %v501_v47  ;;  %928 = vmatprep.subr.bf16.mxu1 %v1268_v36  ;;  %v1252_v43 = vld [vmem:[%s1550_s7 + $0x8] sm:$0xff]   ;;  %v1253_v44 = vld [vmem:[%s1550_s7] sm:$0xff]  }
 0x102   :  { %v473_v49 = vsel %vm1424_vm10, %v468_v46, %v472_v42  ;;  %v1251_v42 = vld [vmem:[%s1550_s7 + $0x10] sm:$0xff]   ;;  %v1102_v46 = vld [vmem:[%s1551_s6] ss:$0 sm:$0xff] }
 0x103   :  { %484 = vrot.lane.b32.xlu0 %v473_v49, %s1265_s29  ;;  %v478_v52 = vrot.slane %v477_v48, 4 }
 0x104   :  { %505 = vrot.lane.b32.xlu1 %v502_v51, %s1264_s28 }
 0x105   :  { %v483_v53 = vsel %vm1424_vm10, %v478_v52, %v482_v50  ;;  %v1255_v52 = vld [vmem:[%s1550_s7 + $0x50] sm:$0xff]  }
 0x107   :  { %486 = vrot.lane.b32.xlu0 %v483_v53, %s1265_s29 }
 0x172   :  { %v504_v54 = vpop.permute.xlu1 %503 }
 0x175   :  { %v485_v55 = vpop.permute.xlu0 %484 }
 0x176   :  { %491 = vst.msk [vmem:[#allocation2] sm:$0xf] %vm490_vm11, %v485_v55  ;;  %v506_v57 = vpop.permute.xlu1 %505 }
 0x177   :  { %510 = vst.msk [vmem:[#allocation2] sm:$0xf] %vm509_vm12, %v504_v54 }
 0x179   :  { %v487_v56 = vpop.permute.xlu0 %486 }
 0x17a   :  { %492 = vst.msk [vmem:[#allocation2 + $0x4] sm:$0xf] %vm490_vm11, %v487_v56  ;;  %v1256_v56 = vld [vmem:[%s1550_s7 + $0x48] sm:$0xff]   ;;  %vm799_vm11 = vcmask 1041920  }
 0x17b   :  { %511 = vst.msk [vmem:[#allocation2 + $0x4] sm:$0xf] %vm509_vm12, %v506_v57  ;;  %vm973_vm12 = vcmask 1046528  }
 0x182   :  { %v1238_v58 = vld [vmem:[#allocation2] sm:$0xff]  }
 0x183   :  { %1165 = vmatmul.mubr.msk.bf16.vlgmr.msra.gmra.mxu1 %vm541_vm13, %v1238_v58  ;;  %vm990_vm13 = vcmask 254976  }
 0x184   :  { %929 = vmatpush1.bf16.msra.mxu1 %v1246_v37 }
 0x185   :  { %930 = vmatprep.subr.bf16.mxu1 %v1268_v36 }
 0x188   :  { %931 = vmatpush1.bf16.msra.mxu1 %v1247_v38 }
 0x189   :  { %932 = vmatprep.subr.bf16.mxu1 %v1268_v36 }
 0x18c   :  { %933 = vmatpush1.bf16.msra.mxu1 %v1248_v39 }
 0x18d   :  { %934 = vmatprep.subr.bf16.mxu1 %v1268_v36 }
 0x243   :  { %v586_v62 = vpop.f32.mrf.mxu1 }
 0x244   :  { %v587_v63 = vadd.f32 %v1094_v61, %v586_v62 }
 0x245   :  { %v1166_v0 = vpop.f32.mrf.mxu1 }
 0x246   :  { %v593_v1 = vmax.f32 %v587_v63, 0.0  ;;  %v1257_v0 = vld [vmem:[%s1550_s7 + $0x40] sm:$0xff]  }
 0x247   :  { %v589_v3 = vpop.f32.mrf.mxu1 }
 0x248   :  { %v1135_v4 = vpack.c.bf16 %v593_v1, %v593_v1  ;;  %v590_v5 = vadd.f32 %v1094_v61, %v589_v3 }
 0x249   :  { %v1167_v6 = vpop.f32.mrf.mxu1 }
 0x24a   :  { %v594_v7 = vmax.f32 %v590_v5, 0.0  ;;  %v608_v8 = vshrl.u32 %v1135_v4, 16  ;;  %v611_v9 = vshll.u32 %v1135_v4, 16  ;;  %604 = vst.msk [vmem:[#allocation3] sm:$0xf] %vm603_vm14, %v1135_v4  ;;  %v1101_v27 = vrot.slane %v1135_v4, 9 }
 0x24c   :  { %v1136_v11 = vpack.c.bf16 %v594_v7, %v594_v7  ;;  %v610_v13 = vrot.slane %v608_v8, 4  ;;  %v613_v14 = vrot.slane %v611_v9, 5 }
 0x24e   :  { %v614_v16 = vor.u32 %v613_v14, %v610_v13  ;;  %v617_v17 = vshll.u32 %v1136_v11, 16  ;;  %v621_v18 = vshrl.u32 %v1136_v11, 16  ;;  %606 = vst.msk [vmem:[#allocation3 + $0x4] sm:$0x7] %vm605_vm15, %v1136_v11  ;;  %v638_v25 = vrot.slane %v1136_v11, 5 }
 0x250   :  { %v615_v19 = vrot.slane %v614_v16, 4  ;;  %v619_v20 = vrot.slane %v617_v17, 5  ;;  %v623_v21 = vrot.slane %v621_v18, 4  ;;  %v639_v28 = vsel %vm1411_vm7, %v1101_v27, %v638_v25  ;;  %v1114_v18 = vld [vmem:[%s1553_s8] ss:$0 sm:$0xff] }
 0x251   :  { %v640_v29 = vrot.slane %v638_v25, 4 }
 0x252   :  { %v620_v23 = vsel %vm1424_vm10, %v615_v19, %v619_v20  ;;  %v624_v24 = vor.u32 %v623_v21, %v619_v20 }
 0x253   :  { %626 = vrot.lane.b32.xlu0 %v620_v23, %s1266_s22 }
 0x254   :  { %v625_v26 = vrot.slane %v624_v24, 4 }
 0x256   :  { %628 = vrot.lane.b32.xlu1 %v625_v26, %s1266_s22 }
 0x257   :  { %641 = vrot.lane.b32.xlu0 %v639_v28, %s1267_s5 }
 0x25a   :  { %643 = vrot.lane.b32.xlu1 %v640_v29, %s1267_s5 }
 0x2c5   :  { %v627_v31 = vpop.permute.xlu0 %626 }
 0x2c6   :  { %633 = vst.msk [vmem:[#allocation3] sm:$0xf] %vm632_vm0, %v627_v31 }
 0x2c8   :  { %v629_v32 = vpop.permute.xlu1 %628 }
 0x2c9   :  { %635 = vst.msk [vmem:[#allocation3 + $0x4] sm:$0x7] %vm634_vm1, %v629_v32  ;;  %v642_v33 = vpop.permute.xlu0 %641 }
 0x2ca   :  { %648 = vst.msk [vmem:[#allocation3] sm:$0xf] %vm647_vm2, %v642_v33 }
 0x2cc   :  { %v644_v34 = vpop.permute.xlu1 %643 }
 0x2cd   :  { %650 = vst.msk [vmem:[#allocation3 + $0x4] sm:$0x7] %vm649_vm3, %v644_v34 }
 0x2d4   :  { %v1245_v35 = vld [vmem:[#allocation3] sm:$0x7f]  }
 0x2d5   :  { %1181 = vmatmul.mubr.msk.bf16.vlgmr.msra.gmra.mxu0 %vm713_vm4, %v1245_v35 }
 0x2d6   :  { %1186 = vmatprep.mubr.msk.bf16.mxu0 %vm1263_vm9, %v1261_v12  ;;  %v1249_v12 = vld [vmem:[%s1550_s7 + $0x20] sm:$0xff]   ;;  %vm797_vm9 = vcmask 1043968  }
 0x2d7   :  { %935 = vmatpush1.bf16.msra.mxu1 %v1249_v12 }
 0x2d8   :  { %936 = vmatprep.subr.bf16.mxu1 %v1268_v36 }
 0x2db   :  { %937 = vmatpush1.bf16.msra.mxu1 %v1250_v40  ;;  %v1130_v40 = vld [vmem:[%s1555_s10] ss:$0 sm:$0xff] }
 0x2dc   :  { %938 = vmatprep.subr.bf16.mxu1 %v1268_v36 }
 0x2df   :  { %939 = vmatpush1.bf16.msra.mxu1 %v1251_v42 }
 0x2e0   :  { %940 = vmatprep.subr.bf16.mxu1 %v1268_v36 }
 0x2e3   :  { %941 = vmatpush1.bf16.msra.mxu1 %v1252_v43 }
 0x2e4   :  { %942 = vmatprep.subr.bf16.mxu1 %v1268_v36 }
 0x2e7   :  { %943 = vmatpush1.bf16.msra.mxu1 %v1253_v44 }
 0x2e8   :  { %952 = vmatprep.subr.bf16.mxu1 %v1268_v36 }
 0x2eb   :  { %953 = vmatpush2.bf16.msra.mxu1 %v1254_v45 }
 0x2ec   :  { %954 = vmatprep.subr.bf16.mxu1 %v1268_v36 }
 0x2ef   :  { %955 = vmatpush2.bf16.msra.mxu1 %v1255_v52 }
 0x2f0   :  { %956 = vmatprep.subr.bf16.mxu1 %v1268_v36 }
 0x2f3   :  { %957 = vmatpush2.bf16.msra.mxu1 %v1256_v56 }
 0x2f4   :  { %958 = vmatprep.subr.bf16.mxu1 %v1268_v36 }
 0x2f7   :  { %959 = vmatpush2.bf16.msra.mxu1 %v1257_v0 }
 0x395   :  { %v751_v47 = vpop.f32.mrf.mxu0 }
 0x396   :  { %v752_v48 = vadd.f32 %v1102_v46, %v751_v47 }
 0x397   :  { %v1182_v49 = vpop.f32.mrf.mxu0 }
 0x398   :  { %v758_v50 = vmax.f32 %v752_v48, 0.0 }
 0x399   :  { %v754_v51 = vpop.f32.mrf.mxu0 }
 0x39a   :  { %v1137_v53 = vpack.c.bf16 %v758_v50, %v758_v50  ;;  %v755_v54 = vadd.f32 %v1102_v46, %v754_v51 }
 0x39b   :  { %v1183_v55 = vpop.f32.mrf.mxu0 }
 0x39c   :  { %v759_v57 = vmax.f32 %v755_v54, 0.0  ;;  %v773_v58 = vshrl.u32 %v1137_v53, 16  ;;  %v776_v59 = vshll.u32 %v1137_v53, 16  ;;  %769 = vst.msk [vmem:[#allocation4] sm:$0xf] %vm768_vm5, %v1137_v53  ;;  %v1113_v63 = vrot.slane %v1137_v53, 9 }
 0x39e   :  { %v1138_v60 = vpack.c.bf16 %v759_v57, %v759_v57  ;;  %v775_v61 = vrot.slane %v773_v58, 4  ;;  %v778_v62 = vrot.slane %v776_v59, 5 }
 0x3a0   :  { %v803_v1 = vrot.slane %v1138_v60, 5  ;;  %v779_v2 = vor.u32 %v778_v62, %v775_v61  ;;  %v782_v3 = vshll.u32 %v1138_v60, 16  ;;  %v786_v4 = vshrl.u32 %v1138_v60, 16  ;;  %771 = vst.msk [vmem:[#allocation4 + $0x8] sm:$0x3] %vm770_vm8, %v1138_v60 }
 0x3a2   :  { %v780_v5 = vrot.slane %v779_v2, 4  ;;  %v784_v6 = vrot.slane %v782_v3, 5  ;;  %v788_v7 = vrot.slane %v786_v4, 4  ;;  %v804_v8 = vsel %vm1411_vm7, %v1113_v63, %v803_v1 }
 0x3a3   :  { %808 = vst.msk [vmem:[#allocation4 + $0x4] sm:$0xf] %vm768_vm5, %v804_v8  ;;  %v805_v9 = vrot.slane %v803_v1, 4  ;;  %vm924_vm7 = vcmask 523264  }
 0x3a4   :  { %v785_v10 = vsel %vm1424_vm10, %v780_v5, %v784_v6  ;;  %v789_v11 = vor.u32 %v788_v7, %v784_v6  ;;  %vm988_vm10 = vcmask 261120  }
 0x3a5   :  { %791 = vrot.lane.b32.xlu0 %v785_v10, %s1267_s5  ;;  %809 = vst.msk [vmem:[#allocation4 + $0xc] sm:$0x3] %vm770_vm8, %v805_v9  ;;  %v1007_v17 = vsel %vm988_vm10, %v995_v41, 0 }
 0x3a6   :  { %v790_v13 = vrot.slane %v789_v11, 4  ;;  %1185 = vmatpush3.bf16.xpose.msra.mxu0 %v1007_v17 }
 0x3a8   :  { %793 = vrot.lane.b32.xlu1 %v790_v13, %s1267_s5 }
 0x3ac   :  { %v1258_v15 = vld [vmem:[#allocation4 + $0x4] ss:$8 sps:$4 sm:$0x3f]  }
 0x3ad   :  { %1129 = vmatprep.mubr.msk.bf16.mxu1 %vm924_vm7, %v1258_v15 }
 0x417   :  { %v792_v14 = vpop.permute.xlu0 %791 }
 0x418   :  { %798 = vst.msk [vmem:[#allocation4] sm:$0xf] %vm797_vm9, %v792_v14 }
 0x41a   :  { %v794_v30 = vpop.permute.xlu1 %793 }
 0x41b   :  { %800 = vst.msk [vmem:[#allocation4 + $0x8] sm:$0x3] %vm799_vm11, %v794_v30 }
 0x422   :  { %v1260_v16 = vld [vmem:[#allocation4] ss:$8 sps:$4 sm:$0x3f]  }
 0x423   :  { %961 = vmatmul.mubr.bf16.vlgmr.msra.gmra.mxu1 %v1260_v16 }
 0x4e3   :  { %v962_v19 = vpop.f32.mrf.mxu1 }
 0x4e4   :  { %v963_v20 = vadd.f32 %v1114_v18, %v962_v19 }
 0x4e5   :  { %v964_v21 = vpop.f32.mrf.mxu1 }
 0x4e6   :  { %v969_v23 = vmax.f32 %v963_v20, 0.0 }
 0x4e7   :  { %v965_v22 = vpop.f32.mrf.mxu1 }
 0x4e8   :  { %v966_v24 = vadd.f32 %v1114_v18, %v965_v22  ;;  %v974_v27 = vrot.slane %v969_v23, 1  ;;  %v981_v31 = vrot.slane %v969_v23, 2 }
 0x4e9   :  { %v967_v25 = vpop.f32.mrf.mxu1 }
 0x4ea   :  { %v970_v26 = vmax.f32 %v966_v24, 0.0 }
 0x4ec   :  { %v975_v28 = vrot.slane %v970_v26, 1  ;;  %v982_v29 = vrot.slane %v970_v26, 2 }
 0x4ee   :  { %v976_v32 = vsel %vm973_vm12, %v974_v27, %v975_v28  ;;  %v980_v33 = vadd.f32 %v975_v28, %v970_v26  ;;  %v983_v35 = vsel %vm546_vm6, %v981_v31, %v982_v29  ;;  %vm1054_vm6 = vcmask 296192  }
 0x4ef   :  { %v979_v34 = vadd.f32 %v976_v32, %v969_v23 }
 0x4f0   :  { %v987_v36 = vadd.f32 %v982_v29, %v980_v33 }
 0x4f1   :  { %v986_v37 = vadd.f32 %v983_v35, %v979_v34 }
 0x4f2   :  { %991 = vst.msk [vmem:[#allocation5 + $0x8] sm:$0x3] %vm990_vm13, %v987_v36 }
 0x4f3   :  { %989 = vst.msk [vmem:[#allocation5] sm:$0xff] %vm988_vm10, %v986_v37 }
 0x4fa   :  { %v992_v38 = vld [vmem:[#allocation5] ss:$9 sm:$0x3] }
 0x4fb   :  { %v993_v39 = vmul.f32 0.33333334, %v992_v38 }
 0x4fd   :  { %v994_v12 = vpack.c.bf16 %v993_v39, %v993_v39  ;;  %1049 = vst.msk [vmem:[%s1554_s11] sm:$0x3] %vm990_vm13, %v993_v39 }
 0x4ff   :  { %1187 = vmatmul.mubr.msk.bf16.vlgmr.msra.gmra.mxu0 %vm988_vm10, %v994_v12 }
 0x5bf   :  { %v1043_v42 = vpop.f32.mrf.mxu0 }
 0x5c0   :  { %v1044_v43 = vadd.f32 %v1130_v40, %v1043_v42 }
 0x5c1   :  { %v1188_v44 = vpop.f32.mrf.mxu0 }
 0x5c2   :  { %1051 = vrot.lane.b32.xlu0 %v1044_v43, %s1266_s22 }
 0x5c3   :  { %v1046_v45 = vpop.f32.mrf.mxu0 }
 0x5c5   :  { %v1189_v46 = vpop.f32.mrf.mxu0 }
 0x634   :  { %v1052_v47 = vpop.permute.xlu0 %1051 }
 0x635   :  { %1055 = vst.msk [vmem:[%s1554_s11] sm:$0x3] %vm1054_vm6, %v1052_v47 }

</bundles_post_ra>
